<compile_context>
chip_gen: v7x
topology: tpu7x:2x2x1
jax: 0.10.0
libtpu: 0.0.40
codegen_flags: <defaults>
</compile_context>

<pallas_src>
import jax
import jax.numpy as jnp
import numpy as np
from jax import lax
from jax.experimental import pallas as pl
from jax.experimental.pallas import tpu as pltpu


# ----------------------------------------------------------------------------
# Kernel: per-utterance AvgPool1d -> 3x Conv1d(+ReLU) -> self-attention pooling
# ----------------------------------------------------------------------------
def _make_kernel(*, K, pad, pool_k, pool_stride, L_pool, L1, L2, L3):
    inv_pool_k = 1.0 / float(pool_k)
    same_len = (L1 == L2)

    def conv_layer(scratch_ref, x, L_in, L_out, w_ref, b_ref, relu, zero_mode):
        # Place this layer's input into the scratch interior; halo rows stay zero.
        if zero_mode == "full":
            scratch_ref[...] = jnp.zeros(scratch_ref.shape, scratch_ref.dtype)
        elif zero_mode == "halo" and pad > 0:
            z = jnp.zeros((pad, scratch_ref.shape[1]), scratch_ref.dtype)
            scratch_ref[pl.ds(0, pad), :] = z
            scratch_ref[pl.ds(pad + L_in, pad), :] = z
        scratch_ref[pl.ds(pad, L_in), :] = x                      # f32 store, no concat
        # im2col: K lane-concatenated shifted windows -> ONE bf16 MXU contraction.
        windows = [scratch_ref[pl.ds(k, L_out), :].astype(jnp.bfloat16)
                   for k in range(K)]
        patches = windows[0] if K == 1 else jnp.concatenate(windows, axis=1)
        y = jnp.dot(patches, w_ref[...], preferred_element_type=jnp.float32)
        y = y + b_ref[...]                                        # f32 bias / epilogue
        return jnp.maximum(y, 0.0) if relu else y

    def kernel(mask_ref, feat_ref, w1_ref, b1_ref, w2_ref, b2_ref,
               w3_ref, b3_ref, wa_ref, ba_ref, out_ref, pad1_ref, pad2_ref):
        # mask_ref : f32[L3, 1]            additive attention mask (0 / -1e9)
        # feat_ref : bf16[S, n_rows, D_in] phase-split padded utterance:
        #                                  feat_ref[p, r, :] == x_padded[r*S + p, :]
        # w*_ref   : bf16[K*Cin, Cout]     im2col conv weights (constant index maps)
        # b*_ref   : f32[1, Cout]
        # wa_ref   : f32[H, 1], ba_ref: f32[1, 1]
        # out_ref  : f32[1, H]
        # pad*_ref : f32 VMEM scratch holding the zero-padded conv inputs

        # ---- AvgPool1d(pool_k, stride=pool_stride, padding=pool_pad),
        #      count_include_pad=True: pool_k unit-stride phase-plane reads (VPU). ----
        acc = feat_ref[0, pl.ds(0, L_pool), :].astype(jnp.float32)
        for k in range(1, pool_k):                                # static unroll
            acc = acc + feat_ref[k % pool_stride,
                                 pl.ds(k // pool_stride, L_pool), :].astype(jnp.float32)
        h0 = acc * inv_pool_k                                     # (L_pool, D_in) f32

        # ---- Conv1d x3 as single im2col contractions on the MXU ----
        h1 = conv_layer(pad1_ref, h0, L_pool, L1, w1_ref, b1_ref,
                        relu=True, zero_mode="halo")
        h2 = conv_layer(pad2_ref, h1, L1, L2, w2_ref, b2_ref,
                        relu=True, zero_mode="halo" if same_len else "full")
        h3 = conv_layer(pad2_ref, h2, L2, L3, w3_ref, b3_ref,
                        relu=False, zero_mode="none" if same_len else "full")

        # ---- SelfAttentionPooling (f32, additive mask, max-subtracted softmax) ----
        logits = jnp.dot(h3, wa_ref[...], preferred_element_type=jnp.float32)
        logits = logits + ba_ref[...] + mask_ref[...]             # (L3, 1)
        m = jnp.max(logits, axis=0, keepdims=True)
        e = jnp.exp(logits - m)
        att = e * pl.reciprocal(jnp.sum(e, axis=0, keepdims=True), approx=True)
        out_ref[...] = jnp.sum(h3 * att, axis=0, keepdims=True).astype(out_ref.dtype)

    return kernel


# ----------------------------------------------------------------------------
# Wrapper
# ----------------------------------------------------------------------------
def cnn_self_attention_forward(features, att_mask, params, *, kernel_size,
                               padding, pooling):
    """features [B,T,D_in] f32, att_mask [B,L3] additive f32, params in torch layout."""
    B, T, D_in = features.shape
    H = params["conv1_w"].shape[0]
    K = kernel_size
    pool_k, S, Pp = kernel_size, pooling, padding

    L_pool = (T + 2 * Pp - pool_k) // S + 1
    L1 = L_pool + 2 * padding - K + 1
    L2 = L1 + 2 * padding - K + 1
    L3 = L2 + 2 * padding - K + 1
    assert att_mask.shape == (B, L3), (att_mask.shape, (B, L3))

    # ---- layout plumbing, once, in the wrapper (MXU operands -> bf16) ----
    # Phase-split the zero-padded features so the kernel's pool reads are
    # unit-stride: phased[b, p, r, :] == x_padded[b, r*S + p, :].
    T_pad = T + 2 * Pp
    n_rows = -(-T_pad // S)
    xp = jnp.pad(features.astype(jnp.bfloat16),
                 ((0, 0), (Pp, Pp + n_rows * S - T_pad), (0, 0)))
    phased = jnp.transpose(xp.reshape(B, n_rows, S, D_in), (0, 2, 1, 3))

    def im2col_w(w):  # torch (Cout, Cin, K) -> (K*Cin, Cout) bf16, row = k*Cin + cin
        cout, cin, kk = w.shape
        return jnp.transpose(w, (2, 1, 0)).reshape(kk * cin, cout).astype(jnp.bfloat16)

    w1 = im2col_w(params["conv1_w"])
    w2 = im2col_w(params["conv2_w"])
    w3 = im2col_w(params["conv3_w"])
    b1 = params["conv1_b"].reshape(1, H).astype(jnp.float32)
    b2 = params["conv2_b"].reshape(1, H).astype(jnp.float32)
    b3 = params["conv3_b"].reshape(1, H).astype(jnp.float32)
    wa = jnp.transpose(params["att_w"]).astype(jnp.float32)          # (H, 1)
    ba = params["att_b"].reshape(1, 1).astype(jnp.float32)
    mask3 = att_mask.astype(jnp.float32).reshape(B, L3, 1)

    kernel = _make_kernel(K=K, pad=padding, pool_k=pool_k, pool_stride=S,
                          L_pool=L_pool, L1=L1, L2=L2, L3=L3)

    grid_spec = pltpu.PrefetchScalarGridSpec(
        num_scalar_prefetch=0,
        grid=(B,),
        in_specs=[
            pl.BlockSpec((None, L3, 1), lambda b: (b, 0, 0)),               # att mask
            pl.BlockSpec((None, S, n_rows, D_in), lambda b: (b, 0, 0, 0)),  # features
            pl.BlockSpec((K * D_in, H), lambda b: (0, 0)),                  # conv1 w
            pl.BlockSpec((1, H), lambda b: (0, 0)),                         # conv1 b
            pl.BlockSpec((K * H, H), lambda b: (0, 0)),                     # conv2 w
            pl.BlockSpec((1, H), lambda b: (0, 0)),
            pl.BlockSpec((K * H, H), lambda b: (0, 0)),                     # conv3 w
            pl.BlockSpec((1, H), lambda b: (0, 0)),
            pl.BlockSpec((H, 1), lambda b: (0, 0)),                         # attention W
            pl.BlockSpec((1, 1), lambda b: (0, 0)),                         # attention b
        ],
        out_specs=pl.BlockSpec((None, 1, H), lambda b: (b, 0, 0)),
        scratch_shapes=[
            pltpu.VMEM((L_pool + 2 * padding, D_in), jnp.float32),          # conv1 in
            pltpu.VMEM((max(L1, L2) + 2 * padding, H), jnp.float32),        # conv2/3 in
        ],
    )

    # Generation-aware scoped-VMEM budget (v7x: 64 MiB physical; v5e/v6e: 128 MiB).
    try:
        vmem_cap = int(pltpu.get_tpu_info().vmem_capacity_bytes)
    except Exception:  # not on TPU / API drift -> conservative default
        vmem_cap = 128 * 1024 * 1024
    vmem_limit = max(32 * 1024 * 1024, min(48 * 1024 * 1024, (vmem_cap * 3) // 5))

    pooled = pl.pallas_call(
        kernel,
        out_shape=jax.ShapeDtypeStruct((B, 1, H), jnp.float32),
        grid_spec=grid_spec,
        compiler_params=pltpu.CompilerParams(
            # v7x: shard utterances across both TensorCores; no-op on v5e/v6e.
            dimension_semantics=("parallel",),
            vmem_limit_bytes=vmem_limit,
        ),
    )(mask3, phased, w1, b1, w2, b2, w3, b3, wa, ba).reshape(B, H)

    # 2-layer MLP head in plain XLA: two tiny GEMMs on the pooled (B, H) slab;
    # a second pallas_call would cost more in launch + HBM round-trip (perf review).
    hid = jnp.maximum(pooled @ jnp.transpose(params["fc1_w"]) + params["fc1_b"], 0.0)
    return hid @ jnp.transpose(params["fc2_w"]) + params["fc2_b"]


# ----------------------------------------------------------------------------
# Pure-JAX f32 reference (independent implementation)
# ----------------------------------------------------------------------------
def _reference(features, att_mask, params, *, kernel_size, padding, pooling):
    B, T, D_in = features.shape
    P, K, S = padding, kernel_size, pooling

    # AvgPool1d(K, stride=S, padding=P), count_include_pad=True
    xp = jnp.pad(features, ((0, 0), (P, P), (0, 0)))
    L = (T + 2 * P - K) // S + 1
    idx = jnp.arange(L)[:, None] * S + jnp.arange(K)[None, :]
    h = jnp.mean(xp[:, idx, :], axis=2)                          # (B, L, D_in)

    def conv(x_blc, w, b):                                       # w: (Cout, Cin, K)
        y = lax.conv_general_dilated(
            jnp.transpose(x_blc, (0, 2, 1)), w, window_strides=(1,),
            padding=[(P, P)], dimension_numbers=("NCH", "OIH", "NCH"))
        return jnp.transpose(y + b[None, :, None], (0, 2, 1))

    h = jax.nn.relu(conv(h, params["conv1_w"], params["conv1_b"]))
    h = jax.nn.relu(conv(h, params["conv2_w"], params["conv2_b"]))
    h = conv(h, params["conv3_w"], params["conv3_b"])            # (B, L3, H)

    att_logits = jnp.einsum("blh,oh->blo", h, params["att_w"])[..., 0]
    att_logits = att_logits + params["att_b"][0] + att_mask
    att_w = jax.nn.softmax(att_logits, axis=-1)[..., None]
    pooled = jnp.sum(h * att_w, axis=1)                          # (B, H)

    z = jax.nn.relu(pooled @ params["fc1_w"].T + params["fc1_b"])
    return z @ params["fc2_w"].T + params["fc2_b"]


if __name__ == "__main__":
    B, T = 2, 16
    input_dim, hidden_dim, output_class_num = 32, 32, 4
    kernel_size, padding, pooling = 5, 2, 2      # dropout: identity at inference

    L_pool = (T + 2 * padding - kernel_size) // pooling + 1
    L3 = L_pool                                  # convs preserve length (K = 2*pad + 1)

    ks = jax.random.split(jax.random.PRNGKey(0), 13)

    def uniform(k, shape, fan_in):
        bound = 1.0 / np.sqrt(fan_in)
        return jax.random.uniform(k, shape, minval=-bound, maxval=bound,
                                  dtype=jnp.float32)

    params = {
        "conv1_w": uniform(ks[0], (hidden_dim, input_dim, kernel_size),
                           input_dim * kernel_size),
        "conv1_b": uniform(ks[1], (hidden_dim,), input_dim * kernel_size),
        "conv2_w": uniform(ks[2], (hidden_dim, hidden_dim, kernel_size),
                           hidden_dim * kernel_size),
        "conv2_b": uniform(ks[3], (hidden_dim,), hidden_dim * kernel_size),
        "conv3_w": uniform(ks[4], (hidden_dim, hidden_dim, kernel_size),
                           hidden_dim * kernel_size),
        "conv3_b": uniform(ks[5], (hidden_dim,), hidden_dim * kernel_size),
        "att_w": uniform(ks[6], (1, hidden_dim), hidden_dim),
        "att_b": uniform(ks[7], (1,), hidden_dim),
        "fc1_w": uniform(ks[8], (hidden_dim, hidden_dim), hidden_dim),
        "fc1_b": uniform(ks[9], (hidden_dim,), hidden_dim),
        "fc2_w": uniform(ks[10], (output_class_num, hidden_dim), hidden_dim),
        "fc2_b": uniform(ks[11], (output_class_num,), hidden_dim),
    }

    features = jax.random.normal(ks[12], (B, T, input_dim), dtype=jnp.float32)

    # Additive attention mask over the (pooled) time axis: 0 = valid, -1e9 = pad.
    valid = jnp.array([L3, L3 - 3], dtype=jnp.int32)
    att_mask = jnp.where(jnp.arange(L3)[None, :] < valid[:, None],
                         0.0, -1e9).astype(jnp.float32)

    out = cnn_self_attention_forward(features, att_mask, params,
                                     kernel_size=kernel_size, padding=padding,
                                     pooling=pooling)
    out = jax.block_until_ready(out)

    ref = _reference(features, att_mask, params, kernel_size=kernel_size,
                     padding=padding, pooling=pooling)
    assert out.shape == (B, output_class_num)
    # bf16 MXU operands (features / conv weights / im2col patches) loosen the
    # tolerance vs the all-f32 reference (per review correctness note).
    assert np.allclose(np.asarray(out), np.asarray(ref), atol=2e-2, rtol=2e-2), (
        np.asarray(out), np.asarray(ref),
        np.max(np.abs(np.asarray(out) - np.asarray(ref))))

    print("KERNEL_OK")
</pallas_src>

<mosaic_0001>
module attributes {stable_mosaic.version = 11 : i64} {
  func.func @kernel(%arg0: i32, %arg1: memref<1x8x1xf32, #tpu.memory_space<vmem>>, %arg2: memref<1x2x10x32xbf16, #tpu.memory_space<vmem>>, %arg3: memref<160x32xbf16, #tpu.memory_space<vmem>>, %arg4: memref<1x32xf32, #tpu.memory_space<vmem>>, %arg5: memref<160x32xbf16, #tpu.memory_space<vmem>>, %arg6: memref<1x32xf32, #tpu.memory_space<vmem>>, %arg7: memref<160x32xbf16, #tpu.memory_space<vmem>>, %arg8: memref<1x32xf32, #tpu.memory_space<vmem>>, %arg9: memref<32x1xf32, #tpu.memory_space<vmem>>, %arg10: memref<1x1xf32, #tpu.memory_space<vmem>>, %arg11: memref<1x1x32xf32, #tpu.memory_space<vmem>>, %arg12: memref<12x32xf32, #tpu.memory_space<vmem>>, %arg13: memref<12x32xf32, #tpu.memory_space<vmem>>) attributes {dimension_semantics = [#tpu.dimension_semantics<parallel>], iteration_bounds = array<i64: 2>, scalar_prefetch = 0 : i64, scratch_operands = 2 : i64, tpu.core_type = #tpu.core_type<tc>, window_params = [{transform_indices = @transform_0, window_bounds = array<i64: 1, 8, 1>}, {transform_indices = @transform_1, window_bounds = array<i64: 1, 2, 10, 32>}, {pipeline_mode = #tpu.pipeline_mode<synchronous>, transform_indices = @transform_2, window_bounds = array<i64: 160, 32>}, {pipeline_mode = #tpu.pipeline_mode<synchronous>, transform_indices = @transform_3, window_bounds = array<i64: 1, 32>}, {pipeline_mode = #tpu.pipeline_mode<synchronous>, transform_indices = @transform_4, window_bounds = array<i64: 160, 32>}, {pipeline_mode = #tpu.pipeline_mode<synchronous>, transform_indices = @transform_5, window_bounds = array<i64: 1, 32>}, {pipeline_mode = #tpu.pipeline_mode<synchronous>, transform_indices = @transform_6, window_bounds = array<i64: 160, 32>}, {pipeline_mode = #tpu.pipeline_mode<synchronous>, transform_indices = @transform_7, window_bounds = array<i64: 1, 32>}, {pipeline_mode = #tpu.pipeline_mode<synchronous>, transform_indices = @transform_8, window_bounds = array<i64: 32, 1>}, {pipeline_mode = #tpu.pipeline_mode<synchronous>, transform_indices = @transform_9, window_bounds = array<i64: 1, 1>}, {transform_indices = @transform_10, window_bounds = array<i64: 1, 1, 32>}]} {
    %c0 = arith.constant 0 : index
    %c0_0 = arith.constant 0 : index
    %c0_1 = arith.constant 0 : index
    %c0_2 = arith.constant 0 : index
    %0 = vector.load %arg2[%c0, %c0_0, %c0_1, %c0_2] : memref<1x2x10x32xbf16, #tpu.memory_space<vmem>>, vector<1x1x8x32xbf16>
    %1 = vector.shape_cast %0 : vector<1x1x8x32xbf16> to vector<8x32xbf16>
    %2 = arith.extf %1 : vector<8x32xbf16> to vector<8x32xf32>
    %c0_3 = arith.constant 0 : index
    %c1 = arith.constant 1 : index
    %c0_4 = arith.constant 0 : index
    %c0_5 = arith.constant 0 : index
    %3 = vector.load %arg2[%c0_3, %c1, %c0_4, %c0_5] : memref<1x2x10x32xbf16, #tpu.memory_space<vmem>>, vector<1x1x8x32xbf16>
    %4 = vector.shape_cast %3 : vector<1x1x8x32xbf16> to vector<8x32xbf16>
    %5 = arith.extf %4 : vector<8x32xbf16> to vector<8x32xf32>
    %6 = arith.addf %2, %5 : vector<8x32xf32>
    %c0_6 = arith.constant 0 : index
    %c0_7 = arith.constant 0 : index
    %c1_8 = arith.constant 1 : index
    %c0_9 = arith.constant 0 : index
    %7 = vector.load %arg2[%c0_6, %c0_7, %c1_8, %c0_9] : memref<1x2x10x32xbf16, #tpu.memory_space<vmem>>, vector<1x1x8x32xbf16>
    %8 = vector.shape_cast %7 : vector<1x1x8x32xbf16> to vector<8x32xbf16>
    %9 = arith.extf %8 : vector<8x32xbf16> to vector<8x32xf32>
    %10 = arith.addf %6, %9 : vector<8x32xf32>
    %c0_10 = arith.constant 0 : index
    %c1_11 = arith.constant 1 : index
    %c1_12 = arith.constant 1 : index
    %c0_13 = arith.constant 0 : index
    %11 = vector.load %arg2[%c0_10, %c1_11, %c1_12, %c0_13] : memref<1x2x10x32xbf16, #tpu.memory_space<vmem>>, vector<1x1x8x32xbf16>
    %12 = vector.shape_cast %11 : vector<1x1x8x32xbf16> to vector<8x32xbf16>
    %13 = arith.extf %12 : vector<8x32xbf16> to vector<8x32xf32>
    %14 = arith.addf %10, %13 : vector<8x32xf32>
    %c0_14 = arith.constant 0 : index
    %c0_15 = arith.constant 0 : index
    %c2 = arith.constant 2 : index
    %c0_16 = arith.constant 0 : index
    %15 = vector.load %arg2[%c0_14, %c0_15, %c2, %c0_16] : memref<1x2x10x32xbf16, #tpu.memory_space<vmem>>, vector<1x1x8x32xbf16>
    %16 = vector.shape_cast %15 : vector<1x1x8x32xbf16> to vector<8x32xbf16>
    %17 = arith.extf %16 : vector<8x32xbf16> to vector<8x32xf32>
    %18 = arith.addf %14, %17 : vector<8x32xf32>
    %cst = arith.constant 2.000000e-01 : f32
    %19 = vector.broadcast %cst : f32 to vector<8x32xf32>
    %20 = arith.mulf %18, %19 : vector<8x32xf32>
    %cst_17 = arith.constant 0.000000e+00 : f32
    %21 = vector.broadcast %cst_17 : f32 to vector<2x32xf32>
    %c0_18 = arith.constant 0 : index
    %c0_19 = arith.constant 0 : index
    %22 = vector.load %arg12[%c0_18, %c0_19] : memref<12x32xf32, #tpu.memory_space<vmem>>, vector<2x32xf32>
    tpu.vector_store %arg12[%c0_18, %c0_19], %21 {strides = array<i32>} : memref<12x32xf32, #tpu.memory_space<vmem>>, vector<2x32xf32>,
    %c10 = arith.constant 10 : index
    %c0_20 = arith.constant 0 : index
    %23 = vector.load %arg12[%c10, %c0_20] : memref<12x32xf32, #tpu.memory_space<vmem>>, vector<2x32xf32>
    tpu.vector_store %arg12[%c10, %c0_20], %21 {strides = array<i32>} : memref<12x32xf32, #tpu.memory_space<vmem>>, vector<2x32xf32>,
    %c2_21 = arith.constant 2 : index
    %c0_22 = arith.constant 0 : index
    %24 = vector.load %arg12[%c2_21, %c0_22] : memref<12x32xf32, #tpu.memory_space<vmem>>, vector<8x32xf32>
    tpu.vector_store %arg12[%c2_21, %c0_22], %20 {strides = array<i32>} : memref<12x32xf32, #tpu.memory_space<vmem>>, vector<8x32xf32>,
    %c0_23 = arith.constant 0 : index
    %c0_24 = arith.constant 0 : index
    %25 = vector.load %arg12[%c0_23, %c0_24] : memref<12x32xf32, #tpu.memory_space<vmem>>, vector<8x32xf32>
    %26 = arith.truncf %25 : vector<8x32xf32> to vector<8x32xbf16>
    %c1_25 = arith.constant 1 : index
    %c0_26 = arith.constant 0 : index
    %27 = vector.load %arg12[%c1_25, %c0_26] : memref<12x32xf32, #tpu.memory_space<vmem>>, vector<8x32xf32>
    %28 = arith.truncf %27 : vector<8x32xf32> to vector<8x32xbf16>
    %c2_27 = arith.constant 2 : index
    %c0_28 = arith.constant 0 : index
    %29 = vector.load %arg12[%c2_27, %c0_28] : memref<12x32xf32, #tpu.memory_space<vmem>>, vector<8x32xf32>
    %30 = arith.truncf %29 : vector<8x32xf32> to vector<8x32xbf16>
    %c3 = arith.constant 3 : index
    %c0_29 = arith.constant 0 : index
    %31 = vector.load %arg12[%c3, %c0_29] : memref<12x32xf32, #tpu.memory_space<vmem>>, vector<8x32xf32>
    %32 = arith.truncf %31 : vector<8x32xf32> to vector<8x32xbf16>
    %c4 = arith.constant 4 : index
    %c0_30 = arith.constant 0 : index
    %33 = vector.load %arg12[%c4, %c0_30] : memref<12x32xf32, #tpu.memory_space<vmem>>, vector<8x32xf32>
    %34 = arith.truncf %33 : vector<8x32xf32> to vector<8x32xbf16>
    %35 = tpu.concatenate %26, %28, %30, %32, %34 in 1 : vector<8x32xbf16>, vector<8x32xbf16>, vector<8x32xbf16>, vector<8x32xbf16>, vector<8x32xbf16> -> vector<8x160xbf16>
    %c0_31 = arith.constant 0 : index
    %c0_32 = arith.constant 0 : index
    %36 = vector.load %arg3[%c0_31, %c0_32] : memref<160x32xbf16, #tpu.memory_space<vmem>>, vector<160x32xbf16>
    %cst_33 = arith.constant dense<0.000000e+00> : vector<8x32xf32>
    %37 = tpu.matmul %35, %36, %cst_33 {dimension_numbers = #tpu.dot_dimension_numbers<[1], [0], [0], [1], [0, 0, 1, 1], [], []>} : vector<8x160xbf16>, vector<160x32xbf16>, vector<8x32xf32> -> vector<8x32xf32>
    %c0_34 = arith.constant 0 : index
    %c0_35 = arith.constant 0 : index
    %38 = vector.load %arg4[%c0_34, %c0_35] : memref<1x32xf32, #tpu.memory_space<vmem>>, vector<1x32xf32>
    %39 = vector.broadcast %38 : vector<1x32xf32> to vector<8x32xf32>
    %40 = arith.addf %37, %39 : vector<8x32xf32>
    %cst_36 = arith.constant 0.000000e+00 : f32
    %41 = vector.broadcast %cst_36 : f32 to vector<8x32xf32>
    %42 = arith.maximumf %40, %41 : vector<8x32xf32>
    %cst_37 = arith.constant 0.000000e+00 : f32
    %43 = vector.broadcast %cst_37 : f32 to vector<2x32xf32>
    %c0_38 = arith.constant 0 : index
    %c0_39 = arith.constant 0 : index
    %44 = vector.load %arg13[%c0_38, %c0_39] : memref<12x32xf32, #tpu.memory_space<vmem>>, vector<2x32xf32>
    tpu.vector_store %arg13[%c0_38, %c0_39], %43 {strides = array<i32>} : memref<12x32xf32, #tpu.memory_space<vmem>>, vector<2x32xf32>,
    %c10_40 = arith.constant 10 : index
    %c0_41 = arith.constant 0 : index
    %45 = vector.load %arg13[%c10_40, %c0_41] : memref<12x32xf32, #tpu.memory_space<vmem>>, vector<2x32xf32>
    tpu.vector_store %arg13[%c10_40, %c0_41], %43 {strides = array<i32>} : memref<12x32xf32, #tpu.memory_space<vmem>>, vector<2x32xf32>,
    %c2_42 = arith.constant 2 : index
    %c0_43 = arith.constant 0 : index
    %46 = vector.load %arg13[%c2_42, %c0_43] : memref<12x32xf32, #tpu.memory_space<vmem>>, vector<8x32xf32>
    tpu.vector_store %arg13[%c2_42, %c0_43], %42 {strides = array<i32>} : memref<12x32xf32, #tpu.memory_space<vmem>>, vector<8x32xf32>,
    %c0_44 = arith.constant 0 : index
    %c0_45 = arith.constant 0 : index
    %47 = vector.load %arg13[%c0_44, %c0_45] : memref<12x32xf32, #tpu.memory_space<vmem>>, vector<8x32xf32>
    %48 = arith.truncf %47 : vector<8x32xf32> to vector<8x32xbf16>
    %c1_46 = arith.constant 1 : index
    %c0_47 = arith.constant 0 : index
    %49 = vector.load %arg13[%c1_46, %c0_47] : memref<12x32xf32, #tpu.memory_space<vmem>>, vector<8x32xf32>
    %50 = arith.truncf %49 : vector<8x32xf32> to vector<8x32xbf16>
    %c2_48 = arith.constant 2 : index
    %c0_49 = arith.constant 0 : index
    %51 = vector.load %arg13[%c2_48, %c0_49] : memref<12x32xf32, #tpu.memory_space<vmem>>, vector<8x32xf32>
    %52 = arith.truncf %51 : vector<8x32xf32> to vector<8x32xbf16>
    %c3_50 = arith.constant 3 : index
    %c0_51 = arith.constant 0 : index
    %53 = vector.load %arg13[%c3_50, %c0_51] : memref<12x32xf32, #tpu.memory_space<vmem>>, vector<8x32xf32>
    %54 = arith.truncf %53 : vector<8x32xf32> to vector<8x32xbf16>
    %c4_52 = arith.constant 4 : index
    %c0_53 = arith.constant 0 : index
    %55 = vector.load %arg13[%c4_52, %c0_53] : memref<12x32xf32, #tpu.memory_space<vmem>>, vector<8x32xf32>
    %56 = arith.truncf %55 : vector<8x32xf32> to vector<8x32xbf16>
    %57 = tpu.concatenate %48, %50, %52, %54, %56 in 1 : vector<8x32xbf16>, vector<8x32xbf16>, vector<8x32xbf16>, vector<8x32xbf16>, vector<8x32xbf16> -> vector<8x160xbf16>
    %c0_54 = arith.constant 0 : index
    %c0_55 = arith.constant 0 : index
    %58 = vector.load %arg5[%c0_54, %c0_55] : memref<160x32xbf16, #tpu.memory_space<vmem>>, vector<160x32xbf16>
    %cst_56 = arith.constant dense<0.000000e+00> : vector<8x32xf32>
    %59 = tpu.matmul %57, %58, %cst_56 {dimension_numbers = #tpu.dot_dimension_numbers<[1], [0], [0], [1], [0, 0, 1, 1], [], []>} : vector<8x160xbf16>, vector<160x32xbf16>, vector<8x32xf32> -> vector<8x32xf32>
    %c0_57 = arith.constant 0 : index
    %c0_58 = arith.constant 0 : index
    %60 = vector.load %arg6[%c0_57, %c0_58] : memref<1x32xf32, #tpu.memory_space<vmem>>, vector<1x32xf32>
    %61 = vector.broadcast %60 : vector<1x32xf32> to vector<8x32xf32>
    %62 = arith.addf %59, %61 : vector<8x32xf32>
    %cst_59 = arith.constant 0.000000e+00 : f32
    %63 = vector.broadcast %cst_59 : f32 to vector<8x32xf32>
    %64 = arith.maximumf %62, %63 : vector<8x32xf32>
    %c2_60 = arith.constant 2 : index
    %c0_61 = arith.constant 0 : index
    %65 = vector.load %arg13[%c2_60, %c0_61] : memref<12x32xf32, #tpu.memory_space<vmem>>, vector<8x32xf32>
    tpu.vector_store %arg13[%c2_60, %c0_61], %64 {strides = array<i32>} : memref<12x32xf32, #tpu.memory_space<vmem>>, vector<8x32xf32>,
    %c0_62 = arith.constant 0 : index
    %c0_63 = arith.constant 0 : index
    %66 = vector.load %arg13[%c0_62, %c0_63] : memref<12x32xf32, #tpu.memory_space<vmem>>, vector<8x32xf32>
    %67 = arith.truncf %66 : vector<8x32xf32> to vector<8x32xbf16>
    %c1_64 = arith.constant 1 : index
    %c0_65 = arith.constant 0 : index
    %68 = vector.load %arg13[%c1_64, %c0_65] : memref<12x32xf32, #tpu.memory_space<vmem>>, vector<8x32xf32>
    %69 = arith.truncf %68 : vector<8x32xf32> to vector<8x32xbf16>
    %c2_66 = arith.constant 2 : index
    %c0_67 = arith.constant 0 : index
    %70 = vector.load %arg13[%c2_66, %c0_67] : memref<12x32xf32, #tpu.memory_space<vmem>>, vector<8x32xf32>
    %71 = arith.truncf %70 : vector<8x32xf32> to vector<8x32xbf16>
    %c3_68 = arith.constant 3 : index
    %c0_69 = arith.constant 0 : index
    %72 = vector.load %arg13[%c3_68, %c0_69] : memref<12x32xf32, #tpu.memory_space<vmem>>, vector<8x32xf32>
    %73 = arith.truncf %72 : vector<8x32xf32> to vector<8x32xbf16>
    %c4_70 = arith.constant 4 : index
    %c0_71 = arith.constant 0 : index
    %74 = vector.load %arg13[%c4_70, %c0_71] : memref<12x32xf32, #tpu.memory_space<vmem>>, vector<8x32xf32>
    %75 = arith.truncf %74 : vector<8x32xf32> to vector<8x32xbf16>
    %76 = tpu.concatenate %67, %69, %71, %73, %75 in 1 : vector<8x32xbf16>, vector<8x32xbf16>, vector<8x32xbf16>, vector<8x32xbf16>, vector<8x32xbf16> -> vector<8x160xbf16>
    %c0_72 = arith.constant 0 : index
    %c0_73 = arith.constant 0 : index
    %77 = vector.load %arg7[%c0_72, %c0_73] : memref<160x32xbf16, #tpu.memory_space<vmem>>, vector<160x32xbf16>
    %cst_74 = arith.constant dense<0.000000e+00> : vector<8x32xf32>
    %78 = tpu.matmul %76, %77, %cst_74 {dimension_numbers = #tpu.dot_dimension_numbers<[1], [0], [0], [1], [0, 0, 1, 1], [], []>} : vector<8x160xbf16>, vector<160x32xbf16>, vector<8x32xf32> -> vector<8x32xf32>
    %c0_75 = arith.constant 0 : index
    %c0_76 = arith.constant 0 : index
    %79 = vector.load %arg8[%c0_75, %c0_76] : memref<1x32xf32, #tpu.memory_space<vmem>>, vector<1x32xf32>
    %80 = vector.broadcast %79 : vector<1x32xf32> to vector<8x32xf32>
    %81 = arith.addf %78, %80 : vector<8x32xf32>
    %c0_77 = arith.constant 0 : index
    %c0_78 = arith.constant 0 : index
    %82 = vector.load %arg9[%c0_77, %c0_78] : memref<32x1xf32, #tpu.memory_space<vmem>>, vector<32x1xf32>
    %cst_79 = arith.constant dense<0.000000e+00> : vector<8x1xf32>
    %83 = tpu.matmul %81, %82, %cst_79 {dimension_numbers = #tpu.dot_dimension_numbers<[1], [0], [0], [1], [0, 0, 1, 1], [], []>} : vector<8x32xf32>, vector<32x1xf32>, vector<8x1xf32> -> vector<8x1xf32>
    %c0_80 = arith.constant 0 : index
    %c0_81 = arith.constant 0 : index
    %84 = vector.load %arg10[%c0_80, %c0_81] : memref<1x1xf32, #tpu.memory_space<vmem>>, vector<1x1xf32>
    %85 = vector.broadcast %84 : vector<1x1xf32> to vector<8x1xf32>
    %86 = arith.addf %83, %85 : vector<8x1xf32>
    %c0_82 = arith.constant 0 : index
    %c0_83 = arith.constant 0 : index
    %c0_84 = arith.constant 0 : index
    %87 = vector.load %arg1[%c0_82, %c0_83, %c0_84] : memref<1x8x1xf32, #tpu.memory_space<vmem>>, vector<1x8x1xf32>
    %88 = vector.shape_cast %87 : vector<1x8x1xf32> to vector<8x1xf32>
    %89 = arith.addf %86, %88 : vector<8x1xf32>
    %cst_85 = arith.constant dense<0xFF800000> : vector<1xf32>
    %90 = vector.multi_reduction <maximumf>, %89, %cst_85 [0] : vector<8x1xf32> to vector<1xf32>
    %91 = vector.shape_cast %90 : vector<1xf32> to vector<1x1xf32>
    %92 = vector.broadcast %91 : vector<1x1xf32> to vector<8x1xf32>
    %93 = arith.subf %89, %92 : vector<8x1xf32>
    %94 = math.exp %93 : vector<8x1xf32>
    %cst_86 = arith.constant dense<0.000000e+00> : vector<1xf32>
    %95 = vector.multi_reduction <add>, %94, %cst_86 [0] : vector<8x1xf32> to vector<1xf32>
    %96 = vector.shape_cast %95 : vector<1xf32> to vector<1x1xf32>
    %97 = tpu.reciprocal %96 {approx = true} : vector<1x1xf32> -> vector<1x1xf32>
    %98 = vector.broadcast %97 : vector<1x1xf32> to vector<8x1xf32>
    %99 = arith.mulf %94, %98 : vector<8x1xf32>
    %100 = vector.broadcast %99 : vector<8x1xf32> to vector<8x32xf32>
    %101 = arith.mulf %81, %100 : vector<8x32xf32>
    %cst_87 = arith.constant dense<0.000000e+00> : vector<32xf32>
    %102 = vector.multi_reduction <add>, %101, %cst_87 [0] : vector<8x32xf32> to vector<32xf32>
    %103 = vector.shape_cast %102 : vector<32xf32> to vector<1x32xf32>
    %c0_88 = arith.constant 0 : index
    %c0_89 = arith.constant 0 : index
    %c0_90 = arith.constant 0 : index
    %104 = vector.load %arg11[%c0_88, %c0_89, %c0_90] : memref<1x1x32xf32, #tpu.memory_space<vmem>>, vector<1x1x32xf32>
    %105 = vector.shape_cast %104 : vector<1x1x32xf32> to vector<1x32xf32>
    %106 = vector.shape_cast %103 : vector<1x32xf32> to vector<1x1x32xf32>
    tpu.vector_store %arg11[%c0_88, %c0_89, %c0_90], %106 {strides = array<i32>} : memref<1x1x32xf32, #tpu.memory_space<vmem>>, vector<1x1x32xf32>,
    return
  }
  func.func @transform_0(%arg0: i32) -> (i32, i32, i32) {
    %c0_i32 = arith.constant 0 : i32
    %c0_i32_0 = arith.constant 0 : i32
    %c0_i32_1 = arith.constant 0 : i32
    return %arg0, %c0_i32, %c0_i32_0 : i32, i32, i32
  }
  func.func @transform_1(%arg0: i32) -> (i32, i32, i32, i32) {
    %c0_i32 = arith.constant 0 : i32
    %c0_i32_0 = arith.constant 0 : i32
    %c0_i32_1 = arith.constant 0 : i32
    %c0_i32_2 = arith.constant 0 : i32
    return %arg0, %c0_i32, %c0_i32_0, %c0_i32_1 : i32, i32, i32, i32
  }
  func.func @transform_2(%arg0: i32) -> (i32, i32) {
    %c0_i32 = arith.constant 0 : i32
    %c0_i32_0 = arith.constant 0 : i32
    %c0_i32_1 = arith.constant 0 : i32
    return %c0_i32, %c0_i32_0 : i32, i32
  }
  func.func @transform_3(%arg0: i32) -> (i32, i32) {
    %c0_i32 = arith.constant 0 : i32
    %c0_i32_0 = arith.constant 0 : i32
    %c0_i32_1 = arith.constant 0 : i32
    return %c0_i32, %c0_i32_0 : i32, i32
  }
  func.func @transform_4(%arg0: i32) -> (i32, i32) {
    %c0_i32 = arith.constant 0 : i32
    %c0_i32_0 = arith.constant 0 : i32
    %c0_i32_1 = arith.constant 0 : i32
    return %c0_i32, %c0_i32_0 : i32, i32
  }
  func.func @transform_5(%arg0: i32) -> (i32, i32) {
    %c0_i32 = arith.constant 0 : i32
    %c0_i32_0 = arith.constant 0 : i32
    %c0_i32_1 = arith.constant 0 : i32
    return %c0_i32, %c0_i32_0 : i32, i32
  }
  func.func @transform_6(%arg0: i32) -> (i32, i32) {
    %c0_i32 = arith.constant 0 : i32
    %c0_i32_0 = arith.constant 0 : i32
    %c0_i32_1 = arith.constant 0 : i32
    return %c0_i32, %c0_i32_0 : i32, i32
  }
  func.func @transform_7(%arg0: i32) -> (i32, i32) {
    %c0_i32 = arith.constant 0 : i32
    %c0_i32_0 = arith.constant 0 : i32
    %c0_i32_1 = arith.constant 0 : i32
    return %c0_i32, %c0_i32_0 : i32, i32
  }
  func.func @transform_8(%arg0: i32) -> (i32, i32) {
    %c0_i32 = arith.constant 0 : i32
    %c0_i32_0 = arith.constant 0 : i32
    %c0_i32_1 = arith.constant 0 : i32
    return %c0_i32, %c0_i32_0 : i32, i32
  }
  func.func @transform_9(%arg0: i32) -> (i32, i32) {
    %c0_i32 = arith.constant 0 : i32
    %c0_i32_0 = arith.constant 0 : i32
    %c0_i32_1 = arith.constant 0 : i32
    return %c0_i32, %c0_i32_0 : i32, i32
  }
  func.func @transform_10(%arg0: i32) -> (i32, i32, i32) {
    %c0_i32 = arith.constant 0 : i32
    %c0_i32_0 = arith.constant 0 : i32
    %c0_i32_1 = arith.constant 0 : i32
    return %arg0, %c0_i32, %c0_i32_0 : i32, i32, i32
  }
}

</mosaic_0001>

<bundles_post_ra>
// kernel: tpu_custom_call.1
= control target key start
LH: loop header
LB: loop body
LE: loop exit
PB: predicated region body
PF: predicated region fallthrough
CT: control target
= control target key end

     0   :  { %s1663_s0 = inlined_call_operand.vmem [shape: f32[2,8,1], index: 0, kind: input, shape index: {}]   ;;  %s1664_s1 = inlined_call_operand.vmem [shape: bf16[2,2,10,32], index: 1, kind: input, shape index: {}]   ;;  %s1665_s2 = inlined_call_operand.vmem [shape: bf16[160,32], index: 2, kind: input, shape index: {}]   ;;  %s1666_s3 = inlined_call_operand.vmem [shape: f32[1,32], index: 3, kind: input, shape index: {}]   ;;  %s1667_s4 = inlined_call_operand.vmem [shape: bf16[160,32], index: 4, kind: input, shape index: {}]   ;;  %s1668_s5 = inlined_call_operand.vmem [shape: f32[1,32], index: 5, kind: input, shape index: {}]   ;;  %s1669_s6 = inlined_call_operand.vmem [shape: bf16[160,32], index: 6, kind: input, shape index: {}]   ;;  %s1670_s7 = inlined_call_operand.vmem [shape: f32[1,32], index: 7, kind: input, shape index: {}]   ;;  %s1671_s8 = inlined_call_operand.vmem [shape: f32[32,1], index: 8, kind: input, shape index: {}]   ;;  %s1672_s9 = inlined_call_operand.<no memory space> [shape: f32[1,1], index: 9, kind: input, shape index: {}]   ;;  %s1673_s10 = inlined_call_operand.hbm [shape: f32[2,1,32], index: 10, kind: output, shape index: {}]  }
   0x1   :  { %v15_v0 = vstv %s1672_s9 }
   0x2   :  { %16 = vst [vmem:[#allocation4] sm:$0x1] %v15_v0 }
   0x3   :  { %17 = vsyncpa [#allocation6], 0 }
   0x4   :  { %19 = vsyncpa [#allocation6 + $0x1], 0  ;;  %s1382_s15 = smov 0   ;;  %s1384_s16 = smov 0  }
   0x5   :  { %s1386_s17 = smov 0   ;;  %s1388_s18 = smov 0  }
   0x6 LB: > { %s1403_s9 = sadd.s32 4294967295, %s1314_s18   ;;  %s1097_s19 = sadd.s32 4294967294, %s1314_s18   ;;  %s1314_s18 = sphi %s1388_s18, %s1679_s18   ;;  %s1310_s17 = sphi %s1386_s17, %s1678_s17   ;;  %s1306_s16 = sphi %s1384_s16, %s1677_s16   ;;  %s1302_s15 = sphi %s1382_s15, %s1676_s15  }
   0x7   : > { %s1407_s20 = sadd.s32 1, %s1314_s18   ;;  %s252_s21 = sadd.s32 1, %s1310_s17 }
   0x8   : > { %s249_s22 = ssub.s32 %s1314_s18, %s1407_s20  ;;  %p262_p0 = scmp.ne.s32.totalorder %s1310_s17, %s1306_s16 }
   0x9   : > { %p250_p1 = scmp.eq.s32.totalorder %s249_s22, 0  ;;  %p263_p2 = scmp.eq.s32.totalorder %s1403_s9, 1 }
   0xa   : > { %p268_p3 = scmp.ne.s32.totalorder %s1306_s16, %s1302_s15  ;;  %p269_p4 = scmp.eq.s32.totalorder %s1097_s19, 1 }
   0xb   : > { %s1418_s23 = scalar_select %p250_p1, %s1310_s17, %s252_s21  }
   0xc   : > { %p1420_p5 = por %p263_p2, %p262_p0  ;;  %p1424_p6 = por %p269_p4, %p268_p3 }
   0xd   : > { %p1100_p7 = scmp.ge.s32.totalorder %s1314_s18, 1  ;;  %p326_p8 = scmp.lt.s32.totalorder %s1314_s18, 3 }
   0xf   : > { %p327_p9 = pnand %p1100_p7, %p326_p8 }
  0x10   : > { %p367_p10 = scmp.lt.s32.totalorder (!%p327_p9), %s1403_s9, 1  ;;  %vm412_vm0 = vcmask (!%p327_p9), 254976   ;;  %v1316_v1 = vmov (!%p327_p9), 0.0   ;;  %v1317_v2 = vmov (!%p327_p9), 0   ;;  %v1218_v3 = vld [vmem:[%s1665_s2] sm:$0xff] (!%p327_p9)   ;;  %v1219_v4 = vld [vmem:[%s1665_s2 + $0x8] sm:$0xff] (!%p327_p9)  }
  0x11   : > { %330 = sbr.rel (%p327_p9) target bundleno = 1510 (0x5e6), region = 60  ;;  %413 = vst.msk [vmem:[#allocation2] sm:$0x3] (!%p327_p9), %vm412_vm0, %v1316_v1  ;;  %414 = vst.msk [vmem:[#allocation2 + $0xa] sm:$0x3] (!%p327_p9), %vm412_vm0, %v1316_v1  ;;  %536 = vmatprep.subr.bf16.mxu0 (!%p327_p9), %v1317_v2  ;;  %697 = vmatprep.subr.bf16.mxu1 (!%p327_p9), %v1317_v2  ;;  %vm387_vm1 = vcmask (!%p327_p9), 1046528  }
  0x12   : > { %577 = vst.msk [vmem:[#allocation3] sm:$0x3] (!%p327_p9), %vm412_vm0, %v1316_v1  ;;  %578 = vst.msk [vmem:[#allocation3 + $0xa] sm:$0x3] (!%p327_p9), %vm412_vm0, %v1316_v1  ;;  %1216 = vset.pattern.permute.xlu1 (!%p327_p9), %v1317_v2  ;;  %1217 = vset.pattern.permute.xlu0 (!%p327_p9), %v1317_v2  ;;  %v1220_v14 = vld [vmem:[%s1665_s2 + $0x10] sm:$0xff] (!%p327_p9)   ;;  %vm405_vm2 = vcmask (!%p327_p9), 1045504  }
  0x13   : > { %537 = vmatpush1.bf16.msra.mxu0 (!%p327_p9), %v1218_v3  ;;  %v1221_v25 = vld [vmem:[%s1665_s2 + $0x18] sm:$0xff] (!%p327_p9)   ;;  %v1222_v28 = vld [vmem:[%s1665_s2 + $0x20] sm:$0xff] (!%p327_p9)   ;;  %vm415_vm3 = vcmask (!%p327_p9), 261120   ;;  %v1223_v31 = vld [vmem:[%s1665_s2 + $0x28] sm:$0xff] (!%p327_p9)   ;;  %s1318_s21 = smov (!%p327_p9), 32   ;;  %s1319_s22 = smov (!%p327_p9), 96  }
  0x14   : > { %538 = vmatprep.subr.bf16.mxu0 (!%p327_p9), %v1317_v2  ;;  %v1224_v32 = vld [vmem:[%s1665_s2 + $0x30] sm:$0xff] (!%p327_p9)   ;;  %v1225_v38 = vld [vmem:[%s1665_s2 + $0x38] sm:$0xff] (!%p327_p9)   ;;  %v1226_v42 = vld [vmem:[%s1665_s2 + $0x40] sm:$0xff] (!%p327_p9)   ;;  %vm439_vm4 = vcmask (!%p327_p9), 523264   ;;  %vm442_vm5 = vcmask (!%p327_p9), 785408   ;;  %vm1322_vm6 = vmmov (!%p327_p9), 0  }
  0x15   : > { %v1227_v43 = vld [vmem:[%s1665_s2 + $0x48] sm:$0xff] (!%p327_p9)   ;;  %v1228_v52 = vld [vmem:[%s1667_s4] sm:$0xff] (!%p327_p9)   ;;  %v1230_v54 = vld [vmem:[%s1667_s4 + $0x10] sm:$0xff] (!%p327_p9)   ;;  %vm982_vm7 = vcmask (!%p327_p9), 7168   ;;  %s1144_s11 = sshll.u32 (!%p327_p9), %s1403_s9, 4  ;;  %vm1015_vm8 = vcmask (!%p327_p9), 253952  }
  0x16   : > { %698 = vmatpush1.bf16.msra.mxu1 (!%p327_p9), %v1228_v52  ;;  %v1229_v53 = vld [vmem:[%s1667_s4 + $0x8] sm:$0xff] (!%p327_p9)   ;;  %v1231_v55 = vld [vmem:[%s1667_s4 + $0x18] sm:$0xff] (!%p327_p9)   ;;  %v1232_v56 = vld [vmem:[%s1667_s4 + $0x20] sm:$0xff] (!%p327_p9)  }
  0x17   : > { %539 = vmatpush1.bf16.msra.mxu0 (!%p327_p9), %v1219_v4  ;;  %699 = vmatprep.subr.bf16.mxu1 (!%p327_p9), %v1317_v2  ;;  %v1233_v57 = vld [vmem:[%s1667_s4 + $0x28] sm:$0xff] (!%p327_p9)   ;;  %v1234_v58 = vld [vmem:[%s1667_s4 + $0x30] sm:$0xff] (!%p327_p9)   ;;  %v1235_v59 = vld [vmem:[%s1667_s4 + $0x38] sm:$0xff] (!%p327_p9)  }
  0x18   : > { %s1436_s26 = scalar_select %p367_p10, %s1403_s9, 1  ;;  %540 = vmatprep.subr.bf16.mxu0 %v1317_v2  ;;  %v1236_v60 = vld [vmem:[%s1667_s4 + $0x40] sm:$0xff]  }
  0x19   : > { %v1106_v61 = vld [vmem:[%s1666_s3] ss:$0 sm:$0xff]  ;;  %s1323_s9 = smov [#allocation5]  }
  0x1a   : > { %s1147_s29 = sshll.u32 %s1436_s26, 4  ;;  %700 = vmatpush1.bf16.msra.mxu1 %v1229_v53  ;;  %s1256_s27 = sshll.u32 %s1323_s9, 4  ;;  %s1257_s27 = int_to_ptr.vmem [resolvable:$false] %s1256_s27 }
  0x1b   : > { %s375_s14 = scalar_lea.vmem %s1664_s1, %s1147_s29  ;;  %541 = vmatpush1.bf16.msra.mxu0 %v1220_v14  ;;  %s1320_s29 = smov 64   ;;  %701 = vmatprep.subr.bf16.mxu1 %v1317_v2 }
  0x1c   : > { %v377_v5 = vld [vmem:[%s375_s14] ss:$8 sps:$4 sm:$0xff]   ;;  %v383_v6 = vld [vmem:[%s375_s14 + $0x4] sm:$0x1]  ;;  %v1105_v7 = vld [vmem:[%s375_s14 + $0xc] sm:$0x1]  ;;  %542 = vmatprep.subr.bf16.mxu0 %v1317_v2 }
  0x1d   : > { %v378_v8 = vunpack.c.l.bf16 %v377_v5  ;;  %v381_v9 = vunpack.c.h.bf16 %v377_v5  ;;  %v384_v10 = vunpack.c.l.bf16 %v383_v6  ;;  %v394_v11 = vunpack.c.l.bf16 %v1105_v7  ;;  %v402_v12 = vld [vmem:[%s375_s14] sm:$0xe]  ;;  %v1237_v6 = vld [vmem:[%s1667_s4 + $0x48] sm:$0xff]   ;;  %s1258_s28 = scalar_lea.vmem %s1257_s27, 32 }
  0x1e   : > { %v403_v13 = vunpack.c.l.bf16 %v402_v12  ;;  %702 = vmatpush1.bf16.msra.mxu1 %v1230_v54 }
  0x1f   : > { %v382_v15 = vadd.f32 %v381_v9, %v378_v8  ;;  %v388_v16 = vrot.slane %v378_v8, 1  ;;  %v389_v17 = vrot.slane %v384_v10, 1  ;;  %v397_v18 = vrot.slane %v381_v9, 1  ;;  %543 = vmatpush1.bf16.msra.mxu0 %v1221_v25  ;;  %703 = vmatprep.subr.bf16.mxu1 %v1317_v2  ;;  %v1240_v25 = vld [vmem:[%s1669_s6 + $0x10] sm:$0xff]  }
  0x20   : > { %v398_v19 = vrot.slane %v394_v11, 1  ;;  %v406_v20 = vrot.slane %v403_v13, 2  ;;  %v407_v21 = vrot.slane %v384_v10, 2  ;;  %544 = vmatprep.subr.bf16.mxu0 %v1317_v2 }
  0x21   : > { %v390_v22 = vsel %vm387_vm1, %v388_v16, %v389_v17 }
  0x22   : > { %v392_v23 = vadd.f32 %v390_v22, %v382_v15  ;;  %v399_v24 = vsel %vm387_vm1, %v397_v18, %v398_v19  ;;  %v408_v26 = vsel %vm405_vm2, %v406_v20, %v407_v21  ;;  %704 = vmatpush1.bf16.msra.mxu1 %v1231_v55 }
  0x23   : > { %545 = vmatpush1.bf16.msra.mxu0 %v1222_v28  ;;  %705 = vmatprep.subr.bf16.mxu1 %v1317_v2  ;;  %v1243_v28 = vld [vmem:[%s1669_s6 + $0x28] sm:$0xff]  }
  0x24   : > { %v401_v27 = vadd.f32 %v399_v24, %v392_v23  ;;  %546 = vmatprep.subr.bf16.mxu0 %v1317_v2  ;;  %v1238_v23 = vld [vmem:[%s1669_s6] sm:$0xff]   ;;  %v1239_v24 = vld [vmem:[%s1669_s6 + $0x8] sm:$0xff]  }
  0x26   : > { %v410_v29 = vadd.f32 %v408_v26, %v401_v27  ;;  %706 = vmatpush1.bf16.msra.mxu1 %v1232_v56  ;;  %v1241_v26 = vld [vmem:[%s1669_s6 + $0x18] sm:$0xff]   ;;  %v1242_v27 = vld [vmem:[%s1669_s6 + $0x20] sm:$0xff]  }
  0x27   : > { %547 = vmatpush1.bf16.msra.mxu0 %v1223_v31  ;;  %707 = vmatprep.subr.bf16.mxu1 %v1317_v2  ;;  %v1246_v31 = vld [vmem:[%s1669_s6 + $0x40] sm:$0xff]  }
  0x28   : > { %v411_v30 = vmul.f32 0.2, %v410_v29  ;;  %548 = vmatprep.subr.bf16.mxu0 %v1317_v2  ;;  %v1244_v29 = vld [vmem:[%s1669_s6 + $0x30] sm:$0xff]  }
  0x2a   : > { %416 = vst.msk [vmem:[#allocation2 + $0x2] sm:$0xff] %vm415_vm3, %v411_v30  ;;  %708 = vmatpush1.bf16.msra.mxu1 %v1233_v57  ;;  %v1245_v30 = vld [vmem:[%s1669_s6 + $0x38] sm:$0xff]  }
  0x2b   : > { %549 = vmatpush1.bf16.msra.mxu0 %v1224_v32  ;;  %709 = vmatprep.subr.bf16.mxu1 %v1317_v2  ;;  %v1118_v32 = vld [vmem:[%s1668_s5] ss:$0 sm:$0xff] }
  0x2c   : > { %550 = vmatprep.subr.bf16.mxu0 %v1317_v2 }
  0x2e   : > { %710 = vmatpush1.bf16.msra.mxu1 %v1234_v58 }
  0x2f   : > { %551 = vmatpush1.bf16.msra.mxu0 %v1225_v38  ;;  %711 = vmatprep.subr.bf16.mxu1 %v1317_v2 }
  0x30   : > { %552 = vmatprep.subr.bf16.mxu0 %v1317_v2 }
  0x31   : > { %v419_v33 = vld [vmem:[#allocation2 + $0x1] sm:$0xff] }
  0x32   : > { %v421_v34 = vld [vmem:[#allocation2 + $0x2] sm:$0xff]  ;;  %v420_v36 = vpack.c.bf16 %v419_v33, %v419_v33  ;;  %712 = vmatpush1.bf16.msra.mxu1 %v1235_v59 }
  0x33   : > { %v423_v35 = vld [vmem:[#allocation2 + $0x3] sm:$0xff]  ;;  %v422_v41 = vpack.c.bf16 %v421_v34, %v421_v34  ;;  %553 = vmatpush1.bf16.msra.mxu0 %v1226_v42  ;;  %713 = vmatprep.subr.bf16.mxu1 %v1317_v2 }
  0x34   : > { %v424_v37 = vpack.c.bf16 %v423_v35, %v423_v35  ;;  %v425_v39 = vld [vmem:[#allocation2 + $0x4] sm:$0xff]  ;;  %428 = vrot.lane.b32.xlu0 %v420_v36, %s1318_s21  ;;  %554 = vmatprep.subr.bf16.mxu0 %v1317_v2 }
  0x35   : > { %v426_v40 = vpack.c.bf16 %v425_v39, %v425_v39  ;;  %v417_v44 = vld [vmem:[#allocation2] sm:$0xff]  ;;  %v1247_v39 = vld [vmem:[%s1669_s6 + $0x48] sm:$0xff]  }
  0x36   : > { %434 = vrot.lane.b32.xlu1 %v424_v37, %s1319_s22  ;;  %v418_v46 = vpack.c.bf16 %v417_v44, %v417_v44  ;;  %714 = vmatpush1.bf16.msra.mxu1 %v1236_v60  ;;  %v899_v44 = vld [vmem:[%s1671_s8 + $0x18] sm:$0xff] }
  0x37   : > { %1117 = vmatprep.mubr.msk.bf16.mxu0 %vm415_vm3, %v426_v40  ;;  %555 = vmatpush1.bf16.msra.mxu0 %v1227_v43  ;;  %v897_v40 = vld [vmem:[%s1671_s8 + $0x8] sm:$0xff]  ;;  %v898_v43 = vld [vmem:[%s1671_s8 + $0x10] sm:$0xff] }
  0x38   : > { %431 = vrot.lane.b32.xlu0 %v422_v41, %s1320_s29  ;;  %856 = vmatprep.subr.bf16.mxu0 %v1317_v2  ;;  %v1321_v41 = vmov 0.0|0.0  }
  0x39   : > { %715 = vmatprep.subr.bf16.mxu1 %v1317_v2 }
  0x3a   : > { %716 = vmatpush1.bf16.msra.mxu1 %v1237_v6  ;;  %v1142_v6 = vld [vmem:[#allocation4] ss:$0 sm:$0xff] }
  0x3b   : > { %1164 = vmatprep.subr.bf16.mxu1 %v1321_v41 }
  0xa6   : > { %v429_v45 = vpop.permute.xlu0 %428 }
  0xa7   : > { %v438_v48 = vsel %vm415_vm3, %v418_v46, %v429_v45 }
  0xa8   : > { %v435_v47 = vpop.permute.xlu1 %434 }
  0xaa   : > { %v432_v49 = vpop.permute.xlu0 %431 }
  0xab   : > { %v441_v50 = vsel %vm439_vm4, %v438_v48, %v432_v49  ;;  %v1168_v48 = vpack.c.bf16 %v899_v44, %v898_v43 }
  0xac   : > { %v444_v51 = vsel %vm442_vm5, %v441_v50, %v435_v47 }
  0xad   : > { %569 = vmatmul.mubr.bf16.vlgmr.msra.gmra.mrb[0].mxu0 %v444_v51 }
  0xae   : > { %857 = vmatpush1.bf16.msra.mxu0 %v1238_v23 }
  0xaf   : > { %858 = vmatprep.subr.bf16.mxu0 %v1317_v2 }
  0xb2   : > { %859 = vmatpush1.bf16.msra.mxu0 %v1239_v24 }
  0xb3   : > { %860 = vmatprep.subr.bf16.mxu0 %v1317_v2 }
  0xb6   : > { %861 = vmatpush1.bf16.msra.mxu0 %v1240_v25 }
  0xb7   : > { %862 = vmatprep.subr.bf16.mxu0 %v1317_v2 }
  0xba   : > { %863 = vmatpush1.bf16.msra.mxu0 %v1241_v26 }
  0xbb   : > { %864 = vmatprep.subr.bf16.mxu0 %v1317_v2 }
  0xbe   : > { %865 = vmatpush1.bf16.msra.mxu0 %v1242_v27 }
  0xbf   : > { %866 = vmatprep.subr.bf16.mxu0 %v1317_v2 }
  0xc2   : > { %867 = vmatpush1.bf16.msra.mxu0 %v1243_v28 }
  0xc3   : > { %868 = vmatprep.subr.bf16.mxu0 %v1317_v2 }
  0xc6   : > { %869 = vmatpush1.bf16.msra.mxu0 %v1244_v29 }
  0xc7   : > { %870 = vmatprep.subr.bf16.mxu0 %v1317_v2 }
  0xca   : > { %871 = vmatpush1.bf16.msra.mxu0 %v1245_v30 }
  0xcb   : > { %872 = vmatprep.subr.bf16.mxu0 %v1317_v2 }
  0xce   : > { %873 = vmatpush1.bf16.msra.mxu0 %v1246_v31 }
  0xcf   : > { %874 = vmatprep.subr.bf16.mxu0 %v1317_v2  ;;  %v896_v2 = vld [vmem:[%s1671_s8] sm:$0xff] }
  0xd0   : > { %v1165_v42 = vpack.c.bf16 %v897_v40, %v896_v2 }
  0xd2   : > { %875 = vmatpush1.bf16.msra.mxu0 %v1247_v39 }
 0x180   : > { %v570_v62 = vpop.f32.mrb[0].mxu0 }
 0x181   : > { %v571_v63 = vadd.f32 %v1106_v61, %v570_v62  ;;  %v572_v0 = vpop.f32.mrb[1].mxu0  ;;  %v1130_v62 = vld [vmem:[%s1670_s7] ss:$0 sm:$0xff] }
 0x182   : > { %v573_v3 = vpop.f32.mrb[2].mxu0 }
 0x183   : > { %v576_v4 = vmax.f32 %v571_v63, 0.0  ;;  %v574_v5 = vpop.f32.mrb[3].mxu0 }
 0x185   : > { %579 = vst.msk [vmem:[#allocation3 + $0x2] sm:$0xff] %vm415_vm3, %v576_v4 }
 0x18c   : > { %v588_v7 = vld [vmem:[#allocation3 + $0x4] sm:$0xff] }
 0x18d   : > { %v584_v8 = vld [vmem:[#allocation3 + $0x2] sm:$0xff]  ;;  %v589_v10 = vpack.c.bf16 %v588_v7, %v588_v7 }
 0x18e   : > { %v582_v9 = vld [vmem:[#allocation3 + $0x1] sm:$0xff]  ;;  %v585_v11 = vpack.c.bf16 %v584_v8, %v584_v8 }
 0x18f   : > { %v583_v12 = vpack.c.bf16 %v582_v9, %v582_v9  ;;  %1129 = vmatprep.mubr.msk.bf16.mxu1 %vm415_vm3, %v589_v10  ;;  %v586_v13 = vld [vmem:[#allocation3 + $0x3] sm:$0xff] }
 0x190   : > { %594 = vrot.lane.b32.xlu0 %v585_v11, %s1320_s29  ;;  %v587_v14 = vpack.c.bf16 %v586_v13, %v586_v13  ;;  %v580_v15 = vld [vmem:[#allocation3] sm:$0xff] }
 0x191   : > { %591 = vrot.lane.b32.xlu1 %v583_v12, %s1318_s21  ;;  %v581_v16 = vpack.c.bf16 %v580_v15, %v580_v15 }
 0x195   : > { %597 = vrot.lane.b32.xlu1 %v587_v14, %s1319_s22 }
 0x202   : > { %v595_v18 = vpop.permute.xlu0 %594 }
 0x203   : > { %v592_v17 = vpop.permute.xlu1 %591 }
 0x204   : > { %v601_v19 = vsel %vm415_vm3, %v581_v16, %v592_v17 }
 0x205   : > { %v603_v21 = vsel %vm439_vm4, %v601_v19, %v595_v18 }
 0x207   : > { %v598_v20 = vpop.permute.xlu1 %597 }
 0x208   : > { %v605_v22 = vsel %vm442_vm5, %v603_v21, %v598_v20 }
 0x209   : > { %730 = vmatmul.mubr.bf16.vlgmr.msra.gmra.mrb[0].mxu1 %v605_v22 }
 0x20a   : > { %1166 = vmatpush3.bf16.msra.mxu1 %v1165_v42  ;;  %1161 = vmatprep.mubr.msk.f32.mxu1 %vm1322_vm6, %v1316_v1 }
 0x20b   : > { %1167 = vmatprep.subr.bf16.mxu1 %v1321_v41 }
 0x20e   : > { %1169 = vmatpush3.bf16.msra.mxu1 %v1168_v48 }
 0x2dc   : > { %v731_v33 = vpop.f32.mrb[0].mxu1 }
 0x2dd   : > { %v732_v34 = vadd.f32 %v1118_v32, %v731_v33  ;;  %v733_v35 = vpop.f32.mrb[1].mxu1 }
 0x2de   : > { %v734_v36 = vpop.f32.mrb[2].mxu1 }
 0x2df   : > { %v737_v37 = vmax.f32 %v732_v34, 0.0  ;;  %v735_v38 = vpop.f32.mrb[3].mxu1 }
 0x2e1   : > { %738 = vst.msk [vmem:[#allocation3 + $0x2] sm:$0xff] %vm415_vm3, %v737_v37 }
 0x2e8   : > { %v747_v45 = vld [vmem:[#allocation3 + $0x4] sm:$0xff] }
 0x2e9   : > { %v743_v46 = vld [vmem:[#allocation3 + $0x2] sm:$0xff]  ;;  %v748_v49 = vpack.c.bf16 %v747_v45, %v747_v45 }
 0x2ea   : > { %v741_v47 = vld [vmem:[#allocation3 + $0x1] sm:$0xff]  ;;  %v744_v50 = vpack.c.bf16 %v743_v46, %v743_v46 }
 0x2eb   : > { %v742_v51 = vpack.c.bf16 %v741_v47, %v741_v47  ;;  %1141 = vmatprep.mubr.msk.bf16.mxu0 %vm415_vm3, %v748_v49  ;;  %v745_v52 = vld [vmem:[#allocation3 + $0x3] sm:$0xff] }
 0x2ec   : > { %753 = vrot.lane.b32.xlu1 %v744_v50, %s1320_s29  ;;  %v746_v53 = vpack.c.bf16 %v745_v52, %v745_v52  ;;  %v739_v54 = vld [vmem:[#allocation3] sm:$0xff] }
 0x2ed   : > { %750 = vrot.lane.b32.xlu0 %v742_v51, %s1318_s21  ;;  %v740_v55 = vpack.c.bf16 %v739_v54, %v739_v54  ;;  %s1621_s21 = scalar_lea.hbm %s1673_s10, %s1144_s11 }
 0x2f1   : > { %756 = vrot.lane.b32.xlu0 %v746_v53, %s1319_s22  ;;  %s1101_s22 = sshll.u32 %s1436_s26, 3  ;;  %s365_s26 = sand.u32 1, %s1306_s16  }
 0x2f2   : > { %s370_s30 = scalar_lea.vmem %s1663_s0, %s1101_s22  ;;  %s366_s12 = scalar_lea.vmem [#allocation5], %s365_s26 }
 0x2f3   : > { %v980_v8 = vld [vmem:[%s370_s30] sm:$0xff]  ;;  %s1030_s13 = sshll.u32 %s366_s12, 4  ;;  %s1018_s29 = scalar_lea.sflag [#allocation6], %s365_s26  ;;  %s1623_s13 = int_to_ptr.vmem [resolvable:$true] %s1030_s13 }
 0x2f4   : > { %s1252_s22 = scalar_lea.vmem %s1623_s13, 16  ;;  %p1259_p0 = scmp.lt.s32.totalorder %s1623_s13, %s1257_s27 }
 0x2f5   : > { %p1253_p11 = scmp.ne.s32.totalorder %s1623_s13, %s1252_s22  ;;  %p1260_p1 = scmp.lt.s32.totalorder %s1258_s28, %s1252_s22 }
 0x2f7   : > { %p1254_p12 = pnand %p1253_p11, %p1420_p5  ;;  %p1261_p2 = por %p1260_p1, %p1259_p0 }
 0x2f9   : > { %p1255_p13 = pneg %p1254_p12 }
 0x2fb   : > { %p1262_p3 = pnand %p1261_p2, %p1255_p13 }
 0x35e   : > { %v754_v57 = vpop.permute.xlu1 %753 }
 0x35f   : > { %v751_v56 = vpop.permute.xlu0 %750 }
 0x360   : > { %v760_v58 = vsel %vm415_vm3, %v740_v55, %v751_v56 }
 0x361   : > { %v762_v60 = vsel %vm439_vm4, %v760_v58, %v754_v57 }
 0x363   : > { %v757_v59 = vpop.permute.xlu0 %756 }
 0x364   : > { %v764_v61 = vsel %vm442_vm5, %v762_v60, %v757_v59 }
 0x365   : > { %889 = vmatmul.mubr.bf16.vlgmr.msra.gmra.mrb[4].mxu0 %v764_v61 }
 0x438   : > { %v890_v63 = vpop.f32.mrb[4].mxu0 }
 0x439   : > { %v891_v0 = vadd.f32 %v1130_v62, %v890_v63  ;;  %v892_v3 = vpop.f32.mrb[5].mxu0 }
 0x43a   : > { %v893_v4 = vpop.f32.mrb[6].mxu0 }
 0x43b   : > { %v894_v5 = vpop.f32.mrb[7].mxu0  ;;  %1162 = vmatmul.mubr.msk.f32.vlgmr.msra.gmra.mrb[4].mxu1 %vm415_vm3, %v891_v0 }
 0x50e   : > { %v976_v7 = vpop.f32.mrb[4].mxu1 }
 0x50f   : > { %v977_v1 = vadd.f32 %v1142_v6, %v976_v7  ;;  %v1163_v9 = vpop.f32.mrb[5].mxu1 }
 0x511   : > { %v981_v10 = vadd.f32 %v980_v8, %v977_v1 }
 0x513   : > { %v983_v11 = vsel %vm982_vm7, %v981_v10, -inf }
 0x514   : > { %v984_v12 = vrot.slane %v983_v11, 4 }
 0x516   : > { %v985_v13 = vmax.f32 %v983_v11, %v984_v12 }
 0x518   : > { %v986_v14 = vrot.slane %v985_v13, 2 }
 0x51a   : > { %v987_v15 = vmax.f32 %v985_v13, %v986_v14 }
 0x51c   : > { %v988_v16 = vrot.slane %v987_v15, 1 }
 0x51e   : > { %v989_v17 = vmax.f32 %v987_v15, %v988_v16 }
 0x520   : > { %v990_v18 = vsub.f32 %v981_v10, %v989_v17 }
 0x522   : > { %v991_v19 = vmul.f32 1.442695, %v990_v18 }
 0x524   : > { %1248 = vpow2.f32 %v991_v19 }
 0x52e   : > { %v1249_v20 = vpop.eup %1248 }
 0x52f   : > { %v993_v21 = vsel %vm982_vm7, %v1249_v20, 0.0 }
 0x530   : > { %v994_v22 = vrot.slane %v993_v21, 4 }
 0x532   : > { %v995_v23 = vadd.f32 %v994_v22, %v993_v21 }
 0x534   : > { %v996_v24 = vrot.slane %v995_v23, 2 }
 0x536   : > { %v997_v25 = vadd.f32 %v996_v24, %v995_v23 }
 0x538   : > { %v998_v26 = vrot.slane %v997_v25, 1 }
 0x53a   : > { %v999_v27 = vadd.f32 %v998_v26, %v997_v25 }
 0x53c   : > { %1250 = vrcp.f32 %v999_v27 }
 0x546   : > { %v1251_v28 = vpop.eup %1250 }
 0x547   : > { %v1001_v29 = vmul.f32 %v1251_v28, %v1249_v20 }
 0x549   : > { %1004 = vperm.xlu1 %1216, %v1001_v29  }
 0x5c8   : > { %v1005_v30 = vpop.permute.xlu1 %1004 }
 0x5c9   : > { %v1007_v31 = vmul.f32 %v1005_v30, %v891_v0 }
 0x5cb   : > { %v1008_v32 = vsel %vm415_vm3, %v1007_v31, 0.0 }
 0x5cc   : > { %v1009_v33 = vrot.slane %v1008_v32, 4 }
 0x5ce   : > { %v1010_v34 = vadd.f32 %v1009_v33, %v1008_v32 }
 0x5d0   : > { %v1011_v35 = vrot.slane %v1010_v34, 2 }
 0x5d2   : > { %v1012_v36 = vadd.f32 %v1011_v35, %v1010_v34 }
 0x5d4   : > { %v1013_v37 = vrot.slane %v1012_v36, 1 }
 0x5d6   : > { %v1014_v38 = vadd.f32 %v1013_v37, %v1012_v36 }
 0x5d8   : > { %1016 = vst.msk [vmem:[%s366_s12] sm:$0x1] %vm1015_vm8, %v1014_v38 }
 0x5d9   : > { %1265 = shalt.err (!%p1262_p3)
}
 0x5da   : > { %s1266_s30 = scalar_lea.hbm %s1621_s21, 16  ;;  %s1270_s12 = scalar_lea.hbm %s1673_s10, 32 }
 0x5db   : > { %p1267_p4 = scmp.ne.s32.totalorder %s1621_s21, %s1266_s30  ;;  %p1271_p9 = scmp.lt.u32.totalorder %s1621_s21, %s1673_s10 }
 0x5dc   : > { %p1272_p10 = scmp.lt.u32.totalorder %s1270_s12, %s1266_s30  ;;  %p1274_p12 = scmp.lt.u32.totalorder %s1266_s30, %s1621_s21 }
 0x5dd   : > { %p1268_p7 = pnand %p1267_p4, %p1420_p5 }
 0x5de   : > { %p1273_p11 = por %p1272_p10, %p1271_p9 }
 0x5df   : > { %p1269_p8 = pneg %p1268_p7 }
 0x5e0   : > { %p1275_p13 = por %p1274_p12, %p1273_p11 }
 0x5e2   : > { %p1276_p0 = pnand %p1275_p13, %p1269_p8 }
 0x5e4   : > { %1279 = shalt.err (!%p1276_p0)
}
 0x5e5   : > { %1170 = dma.vmem_to_hbm [thread:$0]  (%p1420_p5), %s1623_s13, 16, %s1621_s21, %s1018_s29  }
 0x5e6 PF: > { %p1176_p1 = scmp.ge.s32.totalorder %s1314_s18, 2  ;;  %s1042_s22 = sand.u32 1, %s1302_s15  }
 0x5e7   : > { %s1043_s9 = scalar_lea.sflag [#allocation6], %s1042_s22 }
 0x5e8   : > { %p1173_p2 = pnand %p1176_p1, %p1424_p6 }
 0x5ea   : > { %1297 = dma.done.wait (!%p1173_p2), %s1043_s9, 16  }
 0x5eb   : > { %1299 = vsyncadd (!%p1173_p2), %s1043_s9, 4294967280  ;;  %p22_p3 = scmp.ge.s32.totalorder %s1407_s20, 4   ;;  %s1676_s15 = smov %s1306_s16 }
 0x5ec   : > { %s1677_s16 = smov %s1310_s17  ;;  %s1678_s17 = smov %s1418_s23 }
 0x5ed   : > { %s1679_s18 = smov %s1407_s20  ;;  %24 = sbr.rel (!%p22_p3) target bundleno = 6 (0x6), region = 99 }
 0x5f4   :  { %1047 = vsyncpa [#allocation6], 1 }
 0x5f5   :  { %1049 = vsyncpa [#allocation6 + $0x1], 1 }

</bundles_post_ra>
